<compile_context>
chip_gen: v7x
topology: tpu7x:2x2x1
jax: 0.10.0
libtpu: 0.0.40
codegen_flags: <defaults>
</compile_context>

<pallas_src>
import jax
import jax.numpy as jnp
from jax.experimental import pallas as pl
from jax.experimental.pallas import tpu as pltpu

NUM_FEATURES = 32
HIDDEN = 256
NUM_CLASSES = 10


def mlp_softmax_kernel(x_ref, w1_ref, b1_ref, w2_ref, b2_ref, o_ref):
    # layer_1: x @ W1 + b1, ReLU.  Cast x to bf16 *inside* the kernel (VPU cast
    # is free here; a wrapper-side cast would add a full extra HBM pass over x).
    x = x_ref[...].astype(jnp.bfloat16)
    h = jnp.dot(x, w1_ref[...], preferred_element_type=jnp.float32)
    h = jnp.maximum(h + b1_ref[...], 0.0)          # b1 (1, H) broadcasts over batch

    # F.dropout(..., training=self.training): identity in eval mode.
    # TODO(synk): training-mode dropout (pltpu.prng_seed + prng_random_bits mask) not implemented.

    # layer_2: h @ W2 + b2 (cast activations back to bf16 for a single MXU pass).
    logits = jnp.dot(h.astype(w2_ref.dtype), w2_ref[...],
                     preferred_element_type=jnp.float32)
    logits = logits + b2_ref[...]                  # b2 (1, C)

    # Softmax over dim=1 (class axis, last axis of [B, C]).  Exact divide:
    # approx reciprocal previously broke the sum(row)==1 tolerance, and the
    # divide cost is irrelevant in this memory-bound regime.
    m = jnp.max(logits, axis=-1, keepdims=True)
    e = jnp.exp(logits - m)
    denom = jnp.sum(e, axis=-1, keepdims=True)
    o_ref[...] = (e / denom).astype(o_ref.dtype)


def _round_up(n, m):
    return ((n + m - 1) // m) * m


def _cost_estimate(B, F, H, C, x_itemsize, w_itemsize):
    flops = 2 * B * (F * H + H * C)
    transcendentals = B * C                              # exp()
    bytes_accessed = (B * F * x_itemsize                 # x read
                      + B * C * 4                        # out write (f32)
                      + F * H * w_itemsize + H * 4       # w1 + b1
                      + H * C * w_itemsize + C * 4)      # w2 + b2
    return pl.CostEstimate(flops=flops, transcendentals=transcendentals,
                           bytes_accessed=bytes_accessed)


def pytorch_multiclass_forward(x, w1, b1, w2, b2, *, tb=None, grid_less_max=2048):
    """Fused forward pass.  x: [B, F] in caller dtype (no wrapper-side cast)."""
    B, F = x.shape
    H = w1.shape[1]
    C = w2.shape[1]
    cost = _cost_estimate(B, F, H, C, x.dtype.itemsize, w1.dtype.itemsize)

    if B <= grid_less_max:
        # Small/medium problem: everything fits in VMEM; grid-less call with
        # full-array blocks (no per-step pipeline overhead at all).
        return pl.pallas_call(
            mlp_softmax_kernel,
            out_shape=jax.ShapeDtypeStruct((B, C), jnp.float32),
            in_specs=[pl.BlockSpec(memory_space=pltpu.MemorySpace.VMEM)] * 5,
            out_specs=pl.BlockSpec(memory_space=pltpu.MemorySpace.VMEM),
            compiler_params=pltpu.CompilerParams(
                vmem_limit_bytes=32 * 1024 * 1024),
            cost_estimate=cost,
        )(x, w1, b1, w2, b2)

    if tb is None:
        # Big tiles amortize the ~0.35us/step overhead; cap at ceil(B/2)
        # (rounded up to a multiple of 256) so the parallel batch axis keeps
        # >= 2 steps and both v7x TensorCores get work.  2048 keeps the f32
        # hidden/exp intermediates well under v5e's 16 MiB default scoped VMEM.
        tb = min(2048, _round_up(pl.cdiv(B, 2), 256))

    # Ragged last block: no jnp.pad on input, no out[:B] slice on output.
    # Garbage rows past B may go through exp() (possibly inf/NaN) but softmax
    # is strictly per-row and OOB writes are dropped by the pipeline.
    grid = (pl.cdiv(B, tb),)
    return pl.pallas_call(
        mlp_softmax_kernel,
        out_shape=jax.ShapeDtypeStruct((B, C), jnp.float32),
        grid=grid,
        in_specs=[
            pl.BlockSpec((tb, F), lambda i: (i, 0)),
            pl.BlockSpec((F, H), lambda i: (0, 0)),   # weights stay VMEM-resident
            pl.BlockSpec((1, H), lambda i: (0, 0)),
            pl.BlockSpec((H, C), lambda i: (0, 0)),
            pl.BlockSpec((1, C), lambda i: (0, 0)),
        ],
        out_specs=pl.BlockSpec((tb, C), lambda i: (i, 0)),
        compiler_params=pltpu.CompilerParams(
            dimension_semantics=("parallel",),
            vmem_limit_bytes=32 * 1024 * 1024),
        cost_estimate=cost,
    )(x, w1, b1, w2, b2)


def init_params(key):
    """Deterministic init mimicking nn.Linear's uniform(-1/sqrt(fan_in), 1/sqrt(fan_in)).

    Weights stored as [in, out] (transposed vs PyTorch's [out, in]) in bfloat16;
    biases kept in float32 (post-matmul elementwise work stays f32).
    """
    k1, k2, k3, k4 = jax.random.split(key, 4)
    bound1 = 1.0 / jnp.sqrt(NUM_FEATURES)
    bound2 = 1.0 / jnp.sqrt(HIDDEN)
    w1 = jax.random.uniform(k1, (NUM_FEATURES, HIDDEN), jnp.float32,
                            -bound1, bound1).astype(jnp.bfloat16)
    b1 = jax.random.uniform(k2, (1, HIDDEN), jnp.float32, -bound1, bound1)
    w2 = jax.random.uniform(k3, (HIDDEN, NUM_CLASSES), jnp.float32,
                            -bound2, bound2).astype(jnp.bfloat16)
    b2 = jax.random.uniform(k4, (1, NUM_CLASSES), jnp.float32, -bound2, bound2)
    return w1, b1, w2, b2


def reference_forward(x, w1, b1, w2, b2):
    """Pure-JAX reference with the same dtype path (bf16 operands, f32 accum),
    exact divide in the softmax (eval-mode dropout = identity)."""
    xb = x.astype(jnp.bfloat16)
    h = jnp.maximum(jnp.dot(xb, w1, preferred_element_type=jnp.float32) + b1, 0.0)
    logits = jnp.dot(h.astype(jnp.bfloat16), w2,
                     preferred_element_type=jnp.float32) + b2
    return jax.nn.softmax(logits, axis=1)


if __name__ == "__main__":
    key = jax.random.PRNGKey(0)
    kx_small, kx_big, kp = jax.random.split(key, 3)
    w1, b1, w2, b2 = init_params(kp)

    # Small-batch path (grid-less, full-array VMEM blocks).
    x_small = jax.random.normal(kx_small, (8, NUM_FEATURES), jnp.float32)
    out_small = jax.block_until_ready(
        pytorch_multiclass_forward(x_small, w1, b1, w2, b2))
    ref_small = reference_forward(x_small, w1, b1, w2, b2)
    assert out_small.shape == (8, NUM_CLASSES)
    assert jnp.allclose(out_small, ref_small, atol=2e-3, rtol=2e-3)
    assert jnp.allclose(jnp.sum(out_small, axis=1), 1.0, atol=2e-3)

    # Batched / ragged-last-block path (forced with grid_less_max=0):
    # B=300, tb=128 -> 3 grid steps, last block ragged (no wrapper pad/slice).
    x_big = jax.random.normal(kx_big, (300, NUM_FEATURES), jnp.float32)
    out_big = jax.block_until_ready(
        pytorch_multiclass_forward(x_big, w1, b1, w2, b2, tb=128, grid_less_max=0))
    ref_big = reference_forward(x_big, w1, b1, w2, b2)
    assert out_big.shape == (300, NUM_CLASSES)
    assert jnp.allclose(out_big, ref_big, atol=2e-3, rtol=2e-3)
    assert jnp.allclose(jnp.sum(out_big, axis=1), 1.0, atol=2e-3)

    print("KERNEL_OK")
</pallas_src>

<mosaic_0001>
module attributes {stable_mosaic.version = 11 : i64} {
  func.func @mlp_softmax_kernel(%arg0: memref<8x32xf32, #tpu.memory_space<vmem>>, %arg1: memref<32x256xbf16, #tpu.memory_space<vmem>>, %arg2: memref<1x256xf32, #tpu.memory_space<vmem>>, %arg3: memref<256x10xbf16, #tpu.memory_space<vmem>>, %arg4: memref<1x10xf32, #tpu.memory_space<vmem>>, %arg5: memref<8x10xf32, #tpu.memory_space<vmem>>) attributes {dimension_semantics = [], scalar_prefetch = 0 : i64, scratch_operands = 0 : i64, tpu.core_type = #tpu.core_type<tc>} {
    %c0 = arith.constant 0 : index
    %c0_0 = arith.constant 0 : index
    %0 = vector.load %arg0[%c0, %c0_0] : memref<8x32xf32, #tpu.memory_space<vmem>>, vector<8x32xf32>
    %1 = arith.truncf %0 : vector<8x32xf32> to vector<8x32xbf16>
    %c0_1 = arith.constant 0 : index
    %c0_2 = arith.constant 0 : index
    %2 = vector.load %arg1[%c0_1, %c0_2] : memref<32x256xbf16, #tpu.memory_space<vmem>>, vector<32x256xbf16>
    %cst = arith.constant dense<0.000000e+00> : vector<8x256xf32>
    %3 = tpu.matmul %1, %2, %cst {dimension_numbers = #tpu.dot_dimension_numbers<[1], [0], [0], [1], [0, 0, 1, 1], [], []>} : vector<8x32xbf16>, vector<32x256xbf16>, vector<8x256xf32> -> vector<8x256xf32>
    %c0_3 = arith.constant 0 : index
    %c0_4 = arith.constant 0 : index
    %4 = vector.load %arg2[%c0_3, %c0_4] : memref<1x256xf32, #tpu.memory_space<vmem>>, vector<1x256xf32>
    %5 = vector.broadcast %4 : vector<1x256xf32> to vector<8x256xf32>
    %6 = arith.addf %3, %5 : vector<8x256xf32>
    %cst_5 = arith.constant 0.000000e+00 : f32
    %7 = vector.broadcast %cst_5 : f32 to vector<8x256xf32>
    %8 = arith.maximumf %6, %7 : vector<8x256xf32>
    %9 = arith.truncf %8 : vector<8x256xf32> to vector<8x256xbf16>
    %c0_6 = arith.constant 0 : index
    %c0_7 = arith.constant 0 : index
    %10 = vector.load %arg3[%c0_6, %c0_7] : memref<256x10xbf16, #tpu.memory_space<vmem>>, vector<256x10xbf16>
    %cst_8 = arith.constant dense<0.000000e+00> : vector<8x10xf32>
    %11 = tpu.matmul %9, %10, %cst_8 {dimension_numbers = #tpu.dot_dimension_numbers<[1], [0], [0], [1], [0, 0, 1, 1], [], []>} : vector<8x256xbf16>, vector<256x10xbf16>, vector<8x10xf32> -> vector<8x10xf32>
    %c0_9 = arith.constant 0 : index
    %c0_10 = arith.constant 0 : index
    %12 = vector.load %arg4[%c0_9, %c0_10] : memref<1x10xf32, #tpu.memory_space<vmem>>, vector<1x10xf32>
    %13 = vector.broadcast %12 : vector<1x10xf32> to vector<8x10xf32>
    %14 = arith.addf %11, %13 : vector<8x10xf32>
    %cst_11 = arith.constant dense<0xFF800000> : vector<8xf32>
    %15 = vector.multi_reduction <maximumf>, %14, %cst_11 [1] : vector<8x10xf32> to vector<8xf32>
    %16 = vector.shape_cast %15 : vector<8xf32> to vector<8x1xf32>
    %17 = vector.broadcast %16 : vector<8x1xf32> to vector<8x10xf32>
    %18 = arith.subf %14, %17 : vector<8x10xf32>
    %19 = math.exp %18 : vector<8x10xf32>
    %cst_12 = arith.constant dense<0.000000e+00> : vector<8xf32>
    %20 = vector.multi_reduction <add>, %19, %cst_12 [1] : vector<8x10xf32> to vector<8xf32>
    %21 = vector.shape_cast %20 : vector<8xf32> to vector<8x1xf32>
    %22 = vector.broadcast %21 : vector<8x1xf32> to vector<8x10xf32>
    %23 = arith.divf %19, %22 : vector<8x10xf32>
    %c0_13 = arith.constant 0 : index
    %c0_14 = arith.constant 0 : index
    %24 = vector.load %arg5[%c0_13, %c0_14] : memref<8x10xf32, #tpu.memory_space<vmem>>, vector<8x10xf32>
    tpu.vector_store %arg5[%c0_13, %c0_14], %23 {strides = array<i32>} : memref<8x10xf32, #tpu.memory_space<vmem>>, vector<8x10xf32>,
    return
  }
}

</mosaic_0001>

<bundles_post_ra>
// kernel: tpu_custom_call.1
= control target key start
LH: loop header
LB: loop body
LE: loop exit
PB: predicated region body
PF: predicated region fallthrough
CT: control target
= control target key end

     0   :  { %v407_v2 = vmov 0   ;;  %vm60_vm0 = vcmask 261120   ;;  %s523_s0 = inlined_call_operand.vmem [shape: f32[8,32], index: 0, kind: input, shape index: {}]   ;;  %s524_s1 = inlined_call_operand.vmem [shape: bf16[32,256], index: 1, kind: input, shape index: {}]   ;;  %s525_s2 = inlined_call_operand.vmem [shape: f32[1,256], index: 2, kind: input, shape index: {}]   ;;  %s526_s3 = inlined_call_operand.vmem [shape: bf16[256,10], index: 3, kind: input, shape index: {}]   ;;  %s527_s4 = inlined_call_operand.vmem [shape: f32[1,10], index: 4, kind: input, shape index: {}]   ;;  %s528_s5 = inlined_call_operand.hbm [shape: f32[8,10], index: 5, kind: output, shape index: {}]  }
   0x1   :  { %v357_v0 = vld [vmem:[%s524_s1 + $0x4] ss:$8 sps:$4 sm:$0xff]   ;;  %v359_v1 = vld [vmem:[%s524_s1] ss:$8 sps:$4 sm:$0xff]   ;;  %96 = vmatprep.mubr.bf16.mxu0 %v407_v2  ;;  %v360_v3 = vld [vmem:[%s524_s1 + $0x14] ss:$8 sps:$4 sm:$0xff]  }
   0x2   :  { %64 = vmatprep.subr.bf16.mxu0 %v357_v0  ;;  %v362_v4 = vld [vmem:[%s524_s1 + $0x10] ss:$8 sps:$4 sm:$0xff]   ;;  %v22_v5 = vld [vmem:[%s523_s0] sm:$0xff]  ;;  %v365_v8 = vld [vmem:[%s526_s3 + $0x48] sm:$0xff]  }
   0x3   :  { %65 = vmatpush1.bf16.msra.mxu0 %v359_v1  ;;  %v363_v6 = vld [vmem:[%s526_s3 + $0x40] sm:$0xff]   ;;  %v23_v9 = vpack.c.bf16 %v22_v5, %v22_v5  ;;  %v366_v10 = vld [vmem:[%s526_s3 + $0x8] sm:$0xff]   ;;  %v367_v11 = vld [vmem:[%s526_s3 + $0x50] sm:$0xff]  }
   0x4   :  { %66 = vmatprep.subr.bf16.mxu0 %v360_v3  ;;  %v364_v7 = vld [vmem:[%s526_s3] sm:$0xff]   ;;  %333 = vmatprep.subr.bf16.mxu1 %v363_v6  ;;  %v368_v12 = vld [vmem:[%s526_s3 + $0x10] sm:$0xff]   ;;  %v369_v13 = vld [vmem:[%s526_s3 + $0x58] sm:$0xff]  }
   0x5   :  { %334 = vmatpush3.bf16.msra.mxu1 %v364_v7  ;;  %v370_v14 = vld [vmem:[%s526_s3 + $0x18] sm:$0xff]   ;;  %v371_v15 = vld [vmem:[%s526_s3 + $0x60] sm:$0xff]  }
   0x6   :  { %335 = vmatprep.subr.bf16.mxu1 %v365_v8  ;;  %v372_v16 = vld [vmem:[%s526_s3 + $0x20] sm:$0xff]  }
   0x7   :  { %67 = vmatpush1.bf16.msra.mxu0 %v362_v4 }
   0x9   :  { %336 = vmatpush3.bf16.msra.mxu1 %v366_v10 }
   0xa   :  { %315 = vmatmul.mubr.msk.bf16.vlgmr.msra.gmra.mrb[0].mxu0 %vm60_vm0, %v23_v9  ;;  %337 = vmatprep.subr.bf16.mxu1 %v367_v11 }
   0xd   :  { %338 = vmatpush3.bf16.msra.mxu1 %v368_v12 }
   0xe   :  { %339 = vmatprep.subr.bf16.mxu1 %v369_v13 }
  0x11   :  { %340 = vmatpush3.bf16.msra.mxu1 %v370_v14 }
  0x12   :  { %10 = vsyncpa [#allocation3], 0  ;;  %341 = vmatprep.subr.bf16.mxu1 %v371_v15  ;;  %v373_v17 = vld [vmem:[%s526_s3 + $0x68] sm:$0xff]   ;;  %v375_v19 = vld [vmem:[%s526_s3 + $0x70] sm:$0xff]   ;;  %v30_v23 = vlaneseq  ;;  %vm284_vm1 = vcmask 80896  }
  0x13   :  { %v374_v18 = vld [vmem:[%s526_s3 + $0x28] sm:$0xff]   ;;  %v376_v20 = vld [vmem:[%s526_s3 + $0x30] sm:$0xff]   ;;  %v377_v21 = vld [vmem:[%s526_s3 + $0x78] sm:$0xff]  }
  0x14   :  { %v378_v22 = vld [vmem:[%s526_s3 + $0x38] sm:$0xff]   ;;  %v31_v24 = vshrl.u32 %v30_v23, 7  ;;  %v28_v26 = vld [vmem:[%s525_s2] sm:$0x3]  ;;  %s408_s2 = smov [#allocation2]  }
  0x15   :  { %342 = vmatpush3.bf16.msra.mxu1 %v372_v16  ;;  %v316_v42 = vld [vmem:[%s527_s4] ss:$0 sm:$0xff]  ;;  %s303_s4 = sshll.u32 %s408_s2, 4  ;;  %s304_s4 = int_to_ptr.vmem [resolvable:$true] %s303_s4 }
  0x16   :  { %343 = vmatprep.subr.bf16.mxu1 %v373_v17  ;;  %v32_v25 = vsub.s32 0, %v31_v24  ;;  %v36_v27 = vsub.s32 1, %v31_v24  ;;  %s383_s0 = scalar_lea.vmem %s304_s4, 128  ;;  %p388_p1 = scmp.lt.s32.totalorder %s304_s4, %s304_s4 }
  0x17   :  { %p384_p0 = scmp.ne.s32.totalorder %s304_s4, %s383_s0  ;;  %p389_p2 = scmp.lt.s32.totalorder %s383_s0, %s383_s0 }
  0x18   :  { %v33_v28 = vrot.slane %v28_v26, %v32_v25  ;;  %v37_v29 = vrot.slane %v28_v26, %v36_v27 }
  0x19   :  { %344 = vmatpush3.bf16.msra.mxu1 %v374_v18  ;;  %p390_p3 = por %p389_p2, %p388_p1 }
  0x1a   :  { %345 = vmatprep.subr.bf16.mxu1 %v375_v19 }
  0x1b   :  { %p391_p4 = pnand %p390_p3, %p384_p0 }
  0x1d   :  { %346 = vmatpush3.bf16.msra.mxu1 %v376_v20 }
  0x1e   :  { %347 = vmatprep.subr.bf16.mxu1 %v377_v21 }
  0x21   :  { %348 = vmatpush3.bf16.msra.mxu1 %v378_v22 }
  0xdd   :  { %v98_v30 = vpop.f32.mrb[0].mxu0 }
  0xde   :  { %v99_v31 = vadd.f32 %v98_v30, %v33_v28  ;;  %v100_v32 = vpop.f32.mrb[1].mxu0 }
  0xdf   :  { %v101_v33 = vadd.f32 %v100_v32, %v37_v29  ;;  %v102_v34 = vpop.f32.mrb[2].mxu0 }
  0xe0   :  { %v105_v35 = vmax.f32 %v99_v31, 0.0  ;;  %v103_v36 = vpop.f32.mrb[3].mxu0 }
  0xe1   :  { %v106_v37 = vmax.f32 %v101_v33, 0.0 }
  0xe2   :  { %v107_v39 = vpack.c.bf16 %v105_v35, %v105_v35 }
  0xe3   :  { %v108_v38 = vpack.c.bf16 %v106_v37, %v106_v37 }
  0xe5   :  { %276 = vmatprep.mubr.bf16.mxu1 %v108_v38 }
  0xe6   :  { %277 = vmatmul.mubr.bf16.vlgmr.msra.gmra.mrb[0].mxu1 %v107_v39 }
 0x1b9   :  { %v349_v40 = vpop.f32.mrb[0].mxu1 }
 0x1ba   :  { %v350_v41 = vpop.f32.mrb[1].mxu1 }
 0x1bb   :  { %v351_v43 = vadd.f32 %v350_v41, %v349_v40  ;;  %v352_v44 = vpop.f32.mrb[2].mxu1 }
 0x1bc   :  { %v353_v45 = vpop.f32.mrb[3].mxu1 }
 0x1bd   :  { %v279_v46 = vadd.f32 %v351_v43, %v316_v42 }
 0x1bf   :  { %v285_v47 = vsel %vm284_vm1, %v279_v46, -inf }
 0x1c0   :  { %286 = vmax.xlane.f32.xlu0 %v285_v47 }
 0x24d   :  { %v287_v48 = vpop.xlane.xlu0 %286 }
 0x24e   :  { %v288_v49 = vsub.f32 %v279_v46, %v287_v48 }
 0x250   :  { %v289_v50 = vmul.f32 1.442695, %v288_v49 }
 0x252   :  { %379 = vpow2.f32 %v289_v50 }
 0x25c   :  { %v380_v51 = vpop.eup %379 }
 0x25d   :  { %v291_v52 = vsel %vm284_vm1, %v380_v51, 0.0 }
 0x25e   :  { %292 = vadd.xlane.f32.xlu0 %v291_v52 }
 0x2eb   :  { %v293_v53 = vpop.xlane.xlu0 %292 }
 0x2ec   :  { %381 = vrcp.f32 %v293_v53 }
 0x2f6   :  { %v382_v54 = vpop.eup %381 }
 0x2f7   :  { %v295_v55 = vmul.f32 %v382_v54, %v380_v51 }
 0x2f9   :  { %296 = vst.msk [vmem:[#allocation2] sm:$0xff] %vm284_vm1, %v295_v55 }
 0x2fa   :  { %394 = shalt.err (!%p391_p4)
}
 0x2fb   :  { %s395_s12 = scalar_lea.hbm %s528_s5, 128 }
 0x2fc   :  { %p396_p5 = scmp.ne.s32.totalorder %s528_s5, %s395_s12  ;;  %p399_p6 = scmp.lt.u32.totalorder %s395_s12, %s528_s5 }
 0x2fe   :  { %p401_p7 = pnand %p399_p6, %p396_p5 }
 0x300   :  { %404 = shalt.err (!%p401_p7)
}
 0x301   :  { %306 = dma.vmem_to_hbm [thread:$0]  %s304_s4, 128, %s528_s5, [#allocation3]  }
 0x302   :  { %405 = dma.done.wait [#allocation3], 128  }
 0x303   :  { %406 = vsyncadd [#allocation3], 4294967168 }
 0x304   :  { %310 = vsyncpa [#allocation3], 1 }

</bundles_post_ra>
